<compile_context>
chip_gen: v7x
topology: tpu7x:2x2x1
jax: 0.10.0
libtpu: 0.0.40
codegen_flags: <defaults>
</compile_context>

<pallas_src>
import functools

import jax
import jax.numpy as jnp
from jax.experimental import pallas as pl
from jax.experimental.pallas import tpu as pltpu

_LANE = 128
_MXU_MIN_C = 8          # below this, the banded matmul buys nothing; use shifted slices
_BF16_MIN_C = 128       # at/above this, run the band matmul in bf16 (MXU-native)
_TILE_BYTES = 2 << 20   # ~2 MiB input tile: near HBM roofline, fits v7x VMEM budget


def _normalize(xf, acc, *, beta, k):
    """out = x * (k + acc)^-beta with an EUP fast path for beta == 0.75."""
    base = acc + jnp.float32(k)
    if beta == 0.75:
        inv = jax.lax.rsqrt(base)          # base^-1/2  (EUP)
        scale = inv * jnp.sqrt(inv)        # base^-3/4
    else:
        scale = jnp.power(base, -beta)     # generic fallback
    return xf * scale


def _lrn_kernel_band(band_ref, x_ref, o_ref, *, post_scale, beta, k):
    # x_ref / o_ref: (C, T) tile.  band_ref: (C, C), same block every grid step.
    xf = x_ref[...].astype(jnp.float32)
    sq = xf * xf
    band = band_ref[...]
    # For very large C (>~256) a block-banded matmul would cut FLOPs further; the bf16
    # operands already keep this off the critical path for realistic channel counts.
    acc = jnp.dot(band, sq.astype(band.dtype), preferred_element_type=jnp.float32)
    if post_scale != 1.0:                  # bf16 path: alpha/size applied here in f32
        acc = acc * jnp.float32(post_scale)
    o_ref[...] = _normalize(xf, acc, beta=beta, k=k).astype(o_ref.dtype)


def _lrn_kernel_small(x_ref, o_ref, *, size, alpha, beta, k):
    # Tiny channel counts: shifted-slice accumulation (few sublanes; cheap on VPU).
    xf = x_ref[...].astype(jnp.float32)
    C, T = xf.shape
    sq = xf * xf
    pre = size // 2
    post = size - 1 - pre
    padded = sq
    if pre or post:
        padded = jnp.concatenate(
            [jnp.zeros((pre, T), jnp.float32), sq,
             jnp.zeros((post, T), jnp.float32)], axis=0)
    acc = padded[0:C, :]
    for d in range(1, size):
        acc = acc + padded[d:d + C, :]
    acc = acc * jnp.float32(alpha / size)
    o_ref[...] = _normalize(xf, acc, beta=beta, k=k).astype(o_ref.dtype)


def local_response_norm(x, size=5, alpha=1e-4, beta=0.75, k=2.0):
    """Pallas TPU LocalResponseNorm over NCHW input."""
    N, C, H, W = x.shape
    HW = H * W
    itemsize = jnp.dtype(x.dtype).itemsize

    # ---- spatial tile: byte-budgeted, lane-dense, no pad/slice HBM round trip. ----
    target_t = max(_LANE, (_TILE_BYTES // (C * itemsize)) // _LANE * _LANE)
    if HW % _LANE == 0:
        t_hw = min(target_t, HW)           # multiple of 128, <= HW
    elif HW <= target_t:
        t_hw = HW                          # single block == full dim (always legal)
    else:
        t_hw = target_t                    # ragged last block handled by Pallas masking
    # v7x megacore: guarantee >= 2 parallel grid points when N == 1.
    if N == 1 and HW > _LANE and pl.cdiv(HW, t_hw) < 2:
        t_hw = pl.cdiv(pl.cdiv(HW, 2), _LANE) * _LANE
    num_s = pl.cdiv(HW, t_hw)

    xr = x.reshape(N, C, HW)               # layout-preserving reshape (no copy)

    x_spec = pl.BlockSpec((pl.Squeezed(), C, t_hw), lambda n, s: (n, 0, s))
    o_spec = pl.BlockSpec((pl.Squeezed(), C, t_hw), lambda n, s: (n, 0, s))

    operands = []
    in_specs = []
    band_bytes = 0
    if C >= _MXU_MIN_C:
        # Banded matrix built once in the wrapper (hoisted out of the kernel):
        # band[c, j] != 0 iff input channel j is in output channel c's LRN window.
        row = jax.lax.broadcasted_iota(jnp.int32, (C, C), 0)
        col = jax.lax.broadcasted_iota(jnp.int32, (C, C), 1)
        delta = col - row
        pre = size // 2
        post = size - 1 - pre
        band = (delta >= -pre) & (delta <= post)
        if C >= _BF16_MIN_C:
            band = band.astype(jnp.bfloat16)                  # exact 0/1; bf16 MXU
            post_scale = alpha / size
            band_bytes = C * C * 2
        else:
            band = band.astype(jnp.float32) * (alpha / size)  # fold scale; exact f32
            post_scale = 1.0
            band_bytes = C * C * 4
        kernel = functools.partial(_lrn_kernel_band,
                                   post_scale=post_scale, beta=beta, k=k)
        operands.append(band)
        in_specs.append(pl.BlockSpec((C, C), lambda n, s: (0, 0)))
    else:
        kernel = functools.partial(_lrn_kernel_small,
                                   size=size, alpha=alpha, beta=beta, k=k)
    operands.append(xr)
    in_specs.append(x_spec)

    # VMEM budget: double-buffered in + out, ~8 tile-sized f32 temporaries, band, slack.
    tile_in = C * t_hw * itemsize
    tile_f32 = C * t_hw * 4
    vmem_need = 4 * tile_in + 8 * tile_f32 + 2 * band_bytes + (2 << 20)
    vmem_limit = int(min(max(vmem_need, 8 << 20), 56 << 20))

    out = pl.pallas_call(
        kernel,
        out_shape=jax.ShapeDtypeStruct((N, C, HW), x.dtype),
        grid_spec=pltpu.PrefetchScalarGridSpec(
            num_scalar_prefetch=0,
            grid=(N, num_s),
            in_specs=in_specs,
            out_specs=o_spec,
        ),
        compiler_params=pltpu.CompilerParams(
            dimension_semantics=("parallel", "parallel"),
            vmem_limit_bytes=vmem_limit),
    )(*operands)

    return out.reshape(N, C, H, W)


def _lrn_reference(x, size=5, alpha=1e-4, beta=0.75, k=2.0):
    """Pure-JAX reference matching F.local_response_norm (NCHW)."""
    N, C, H, W = x.shape
    sq = (x * x).astype(jnp.float32)
    pre = size // 2
    post = size - 1 - pre
    padded = jnp.pad(sq, ((0, 0), (pre, post), (0, 0), (0, 0)))
    acc = jnp.zeros_like(sq)
    for d in range(size):
        acc = acc + padded[:, d:d + C]
    denom = jnp.power(k + (alpha / size) * acc, beta)
    return (x.astype(jnp.float32) / denom).astype(x.dtype)


if __name__ == "__main__":
    key = jax.random.PRNGKey(0)
    k1, k2, k3 = jax.random.split(key, 3)

    # Case 1: tiny channel count (shifted-slice path), lane-aligned HW.
    x1 = jax.random.normal(k1, (2, 4, 16, 16), dtype=jnp.float32)
    out1 = jax.block_until_ready(local_response_norm(x1, size=5, alpha=1e-4, beta=0.75, k=2.0))
    ref1 = _lrn_reference(x1, size=5, alpha=1e-4, beta=0.75, k=2.0)
    assert out1.shape == x1.shape and out1.dtype == x1.dtype
    assert jnp.allclose(out1, ref1, atol=1e-4, rtol=1e-4), "mismatch vs reference (case 1)"

    # Case 2: MXU banded path; ragged HW=196 covered by one full-dim block (no padding).
    x2 = jax.random.normal(k2, (2, 16, 14, 14), dtype=jnp.float32)
    out2 = jax.block_until_ready(local_response_norm(x2, size=5, alpha=1e-4, beta=0.75, k=2.0))
    ref2 = _lrn_reference(x2, size=5, alpha=1e-4, beta=0.75, k=2.0)
    assert out2.shape == x2.shape and out2.dtype == x2.dtype
    assert jnp.allclose(out2, ref2, atol=1e-4, rtol=1e-4), "mismatch vs reference (case 2)"

    # Case 3: N == 1 megacore split -> 2 spatial tiles with a masked partial last block.
    x3 = jax.random.normal(k3, (1, 8, 20, 20), dtype=jnp.float32)
    out3 = jax.block_until_ready(local_response_norm(x3, size=5, alpha=1e-4, beta=0.75, k=2.0))
    ref3 = _lrn_reference(x3, size=5, alpha=1e-4, beta=0.75, k=2.0)
    assert out3.shape == x3.shape and out3.dtype == x3.dtype
    assert jnp.allclose(out3, ref3, atol=1e-4, rtol=1e-4), "mismatch vs reference (case 3)"

    print("KERNEL_OK")
</pallas_src>

<mosaic_0001>
module attributes {stable_mosaic.version = 11 : i64} {
  func.func @_lrn_kernel_small(%arg0: i32, %arg1: i32, %arg2: memref<1x4x256xf32, #tpu.memory_space<vmem>>, %arg3: memref<1x4x256xf32, #tpu.memory_space<vmem>>) attributes {dimension_semantics = [#tpu.dimension_semantics<parallel>, #tpu.dimension_semantics<parallel>], iteration_bounds = array<i64: 2, 1>, scalar_prefetch = 0 : i64, scratch_operands = 0 : i64, tpu.core_type = #tpu.core_type<tc>, window_params = [{transform_indices = @transform_0, window_bounds = array<i64: 1, 4, 256>}, {transform_indices = @transform_1, window_bounds = array<i64: 1, 4, 256>}]} {
    %c0 = arith.constant 0 : index
    %c0_0 = arith.constant 0 : index
    %c0_1 = arith.constant 0 : index
    %0 = vector.load %arg2[%c0, %c0_0, %c0_1] : memref<1x4x256xf32, #tpu.memory_space<vmem>>, vector<1x4x256xf32>
    %1 = vector.shape_cast %0 : vector<1x4x256xf32> to vector<4x256xf32>
    %2 = arith.mulf %1, %1 : vector<4x256xf32>
    %cst = arith.constant 0.000000e+00 : f32
    %3 = vector.broadcast %cst : f32 to vector<2x256xf32>
    %cst_2 = arith.constant 0.000000e+00 : f32
    %4 = vector.broadcast %cst_2 : f32 to vector<2x256xf32>
    %5 = tpu.concatenate %3, %2, %4 in 0 : vector<2x256xf32>, vector<4x256xf32>, vector<2x256xf32> -> vector<8x256xf32>
    %6 = vector.extract_strided_slice %5 {offsets = [0, 0], sizes = [4, 256], strides = [1, 1]} : vector<8x256xf32> to vector<4x256xf32>
    %7 = vector.extract_strided_slice %5 {offsets = [1, 0], sizes = [4, 256], strides = [1, 1]} : vector<8x256xf32> to vector<4x256xf32>
    %8 = arith.addf %6, %7 : vector<4x256xf32>
    %9 = vector.extract_strided_slice %5 {offsets = [2, 0], sizes = [4, 256], strides = [1, 1]} : vector<8x256xf32> to vector<4x256xf32>
    %10 = arith.addf %8, %9 : vector<4x256xf32>
    %11 = vector.extract_strided_slice %5 {offsets = [3, 0], sizes = [4, 256], strides = [1, 1]} : vector<8x256xf32> to vector<4x256xf32>
    %12 = arith.addf %10, %11 : vector<4x256xf32>
    %13 = vector.extract_strided_slice %5 {offsets = [4, 0], sizes = [4, 256], strides = [1, 1]} : vector<8x256xf32> to vector<4x256xf32>
    %14 = arith.addf %12, %13 : vector<4x256xf32>
    %cst_3 = arith.constant 2.000000e-05 : f32
    %15 = vector.broadcast %cst_3 : f32 to vector<4x256xf32>
    %16 = arith.mulf %14, %15 : vector<4x256xf32>
    %cst_4 = arith.constant 2.000000e+00 : f32
    %17 = vector.broadcast %cst_4 : f32 to vector<4x256xf32>
    %18 = arith.addf %16, %17 : vector<4x256xf32>
    %19 = math.rsqrt %18 : vector<4x256xf32>
    %20 = math.sqrt %19 : vector<4x256xf32>
    %21 = arith.mulf %19, %20 : vector<4x256xf32>
    %22 = arith.mulf %1, %21 : vector<4x256xf32>
    %c0_5 = arith.constant 0 : index
    %c0_6 = arith.constant 0 : index
    %c0_7 = arith.constant 0 : index
    %23 = vector.load %arg3[%c0_5, %c0_6, %c0_7] : memref<1x4x256xf32, #tpu.memory_space<vmem>>, vector<1x4x256xf32>
    %24 = vector.shape_cast %23 : vector<1x4x256xf32> to vector<4x256xf32>
    %25 = vector.shape_cast %22 : vector<4x256xf32> to vector<1x4x256xf32>
    tpu.vector_store %arg3[%c0_5, %c0_6, %c0_7], %25 {strides = array<i32>} : memref<1x4x256xf32, #tpu.memory_space<vmem>>, vector<1x4x256xf32>,
    return
  }
  func.func @transform_0(%arg0: i32, %arg1: i32) -> (i32, i32, i32) {
    %c0_i32 = arith.constant 0 : i32
    %c0_i32_0 = arith.constant 0 : i32
    return %arg0, %c0_i32, %arg1 : i32, i32, i32
  }
  func.func @transform_1(%arg0: i32, %arg1: i32) -> (i32, i32, i32) {
    %c0_i32 = arith.constant 0 : i32
    %c0_i32_0 = arith.constant 0 : i32
    return %arg0, %c0_i32, %arg1 : i32, i32, i32
  }
}

</mosaic_0001>

<bundles_post_ra>
// kernel: tpu_custom_call.1
= control target key start
LH: loop header
LB: loop body
LE: loop exit
PB: predicated region body
PF: predicated region fallthrough
CT: control target
= control target key end

     0   :  { %6 = vsyncpa [#allocation3], 0  ;;  %s711_s0 = inlined_call_operand.hbm [shape: f32[2,4,256], index: 0, kind: input, shape index: {}]   ;;  %s712_s1 = inlined_call_operand.hbm [shape: f32[2,4,256], index: 1, kind: output, shape index: {}]  }
   0x1   :  { %8 = vsyncpa [#allocation3 + $0x1], 0 }
   0x2   :  { %9 = vsyncpa [#allocation4], 0 }
   0x3   :  { %11 = vsyncpa [#allocation4 + $0x1], 0  ;;  %s535_s6 = smov 0   ;;  %s537_s7 = smov 0  }
   0x4   :  { %s539_s8 = smov 0   ;;  %s541_s9 = smov 0  }
   0x5   :  { %s543_s10 = smov 0   ;;  %s545_s11 = smov 0  }
   0x6 LB: > { %s322_s12 = sadd.s32 4294967295, %s521_s11   ;;  %s323_s13 = sadd.s32 4294967294, %s521_s11   ;;  %s521_s11 = sphi %s545_s11, %s17_s11   ;;  %s517_s10 = sphi %s543_s10, %s728_s10   ;;  %s513_s9 = sphi %s541_s9, %s727_s9   ;;  %s509_s8 = sphi %s539_s8, %s726_s8   ;;  %s505_s7 = sphi %s537_s7, %s725_s7   ;;  %s501_s6 = sphi %s535_s6, %s724_s6  }
   0x7   : > { %s29_s14 = sadd.s32 1, %s517_s10  ;;  %s38_s15 = sadd.s32 1, %s509_s8 }
   0x8   : > { %p31_p0 = scmp.ge.s32.totalorder %s29_s14, 2  ;;  %p45_p1 = scmp.ne.s32.totalorder %s509_s8, %s505_s7 }
   0x9   : > { %p46_p2 = scmp.eq.s32.totalorder %s521_s11, 0  ;;  %p51_p3 = scmp.ne.s32.totalorder %s505_s7, %s501_s6 }
   0xa   : > { %s730_s14 = smov (%p31_p0, %s29_s14), 0  ;;  %p52_p5 = scmp.eq.s32.totalorder %s322_s12, 0 }
   0xb   : > { %p576_p4 = por %p46_p2, %p45_p1  ;;  %s33_s17 = ssub.s32 %s517_s10, %s730_s14 }
   0xc   : > { %p77_p6 = scmp.eq.s32.totalorder %s322_s12, 1  ;;  %p36_p7 = scmp.eq.s32.totalorder %s33_s17, 0 }
   0xd   : > { %p582_p8 = por %p52_p5, %p51_p3  ;;  %p83_p10 = scmp.eq.s32.totalorder %s323_s13, 1 }
   0xe   : > { %p586_p9 = por %p77_p6, %p45_p1  ;;  %p351_p13 = scmp.lt.s32.totalorder %s521_s11, 2 }
   0xf   : > { %s591_s20 = scalar_select %p36_p7, %s509_s8, %s38_s15  }
  0x10   : > { %s716_s19 = scalar_select %p586_p9, 1, 0 }
  0x11   : > { %p593_p11 = por %p83_p10, %p51_p3  ;;  %s103_s22 = sand.u32 1, %s509_s8  }
  0x12   : > { %s326_s23 = sshll.u32 %s103_s22, 3  ;;  %s337_s24 = sshll.u32 %s517_s10, 7 }
  0x13   : > { %s717_s21 = scalar_select %p593_p11, 1, 0 }
  0x14   : > { %s604_s27 = scalar_lea.hbm %s711_s0, %s337_s24  ;;  %s107_s28 = scalar_lea.vmem [#allocation2], %s326_s23 }
  0x15   : > { %s117_s29 = sshll.u32 %s107_s28, 4  ;;  %p610_p0 = pnand %p351_p13, %p576_p4  ;;  %s606_s29 = int_to_ptr.vmem [resolvable:$true] %s117_s29 }
  0x16   : > { %s104_s2 = scalar_lea.sflag [#allocation3], %s103_s22  ;;  %s409_s3 = scalar_lea.hbm %s604_s27, 128 }
  0x17   : > { %p410_p3 = scmp.ne.s32.totalorder %s604_s27, %s409_s3  ;;  %p411_p5 = pneg %p610_p0 }
  0x18   : > { %s414_s12 = scalar_lea.hbm %s711_s0, 256  ;;  %p415_p4 = scmp.lt.u32.totalorder %s604_s27, %s711_s0 }
  0x19   : > { %p412_p6 = pnand %p411_p5, %p410_p3  ;;  %p416_p10 = scmp.lt.u32.totalorder %s414_s12, %s409_s3 }
  0x1a   : > { %p418_p12 = scmp.lt.u32.totalorder %s409_s3, %s604_s27 }
  0x1b   : > { %p413_p7 = pneg %p412_p6  ;;  %p417_p13 = por %p416_p10, %p415_p4 }
  0x1d   : > { %p419_p1 = por %p418_p12, %p417_p13 }
  0x1f   : > { %p420_p2 = pnand %p419_p1, %p413_p7 }
  0x21   : > { %423 = shalt.err (!%p420_p2)
}
  0x22   : > { %s424_s16 = scalar_lea.vmem %s606_s29, 128  ;;  %s523_s17 = smov [#allocation2]  }
  0x23   : > { %p425_p3 = scmp.ne.s32.totalorder %s606_s29, %s424_s16  ;;  %s429_s22 = sshll.u32 %s523_s17, 4  ;;  %s430_s22 = int_to_ptr.vmem [resolvable:$false] %s429_s22 }
  0x24   : > { %s431_s23 = scalar_lea.vmem %s430_s22, 256  ;;  %p432_p9 = scmp.lt.s32.totalorder %s606_s29, %s430_s22 }
  0x25   : > { %p427_p6 = pnand %p425_p3, %p411_p5  ;;  %p433_p4 = scmp.lt.s32.totalorder %s431_s23, %s424_s16 }
  0x27   : > { %p428_p11 = pneg %p427_p6  ;;  %p434_p10 = por %p433_p4, %p432_p9 }
  0x29   : > { %p435_p12 = pnand %p434_p10, %p428_p11 }
  0x2b   : > { %438 = shalt.err (!%p435_p12)
}
  0x2c   : > { %346 = dma.hbm_to_vmem [thread:$0]  (!%p610_p0), %s604_s27, 128, %s606_s29, %s104_s2  }
  0x2d   : > { %p719_p1 = scmp.lt.s32.totalorder %s521_s11, 3  ;;  %p720_p2 = scmp.ge.s32.totalorder %s521_s11, 1 }
  0x2f   : > { %p123_p5 = pnand %p720_p2, %p719_p1 }
  0x30   : > { %s646_s24 = sand.u32 (!%p123_p5), 1, %s505_s7  }
  0x31   : > { %126 = sbr.rel (%p123_p5) target bundleno = 126 (0x7e), region = 24  ;;  %s330_s25 = sshll.u32 (!%p123_p5), %s646_s24, 3 }
  0x32   : > { %s129_s26 = scalar_lea.sflag (!%p123_p5), [#allocation3], %s646_s24  ;;  %s132_s28 = scalar_lea.vmem (!%p123_p5), [#allocation2], %s330_s25 }
  0x38   : > { %492 = dma.done.wait (%p582_p8), %s129_s26, 128  }
  0x39   : > { %494 = vsyncadd (%p582_p8), %s129_s26, 4294967168  ;;  %v153_v0 = vld [vmem:[%s132_s28] sm:$0xff]  ;;  %vm161_vm0 = vcmask 1041408   ;;  %vm164_vm1 = vcmask 1045504   ;;  %s150_s18 = scalar_lea.vmem [#allocation5], %s330_s25  ;;  %s338_s29 = sshll.u32 %s513_s9, 7 }
  0x3a   : > { %v154_v1 = vmul.f32 %v153_v0, %v153_v0  ;;  %s238_s27 = sshll.u32 %s150_s18, 4  ;;  %s664_s3 = scalar_lea.hbm %s712_s1, %s338_s29  ;;  %s659_s27 = int_to_ptr.vmem [resolvable:$true] %s238_s27 }
  0x3b   : > { %s222_s4 = scalar_lea.sflag [#allocation4], %s646_s24  ;;  %s439_s5 = scalar_lea.vmem %s659_s27, 128 }
  0x3c   : > { %v156_v2 = vcombine.high %v154_v1, %v154_v1  ;;  %v157_v3 = vrot.slane %v154_v1, 6  ;;  %p440_p8 = scmp.ne.s32.totalorder %s659_s27, %s439_s5  ;;  %p721_p9 = scmp.ne.s32.totalorder %s716_s19, 0 }
  0x3d   : > { %s524_s9 = smov [#allocation5]  }
  0x3e   : > { %v158_v4 = vrot.slane %v156_v2, 6  ;;  %v162_v5 = vsel %vm161_vm0, 0.0, %v157_v3  ;;  %p441_p11 = pnand %p440_p8, %p721_p9  ;;  %s443_s12 = sshll.u32 %s524_s9, 4  ;;  %s444_s12 = int_to_ptr.vmem [resolvable:$false] %s443_s12 }
  0x3f   : > { %v165_v6 = vsel %vm164_vm1, %v162_v5, 0.0  ;;  %s445_s13 = scalar_lea.vmem %s444_s12, 256  ;;  %p446_p7 = scmp.lt.s32.totalorder %s659_s27, %s444_s12 }
  0x40   : > { %v163_v7 = vsel %vm161_vm0, 0.0, %v158_v4  ;;  %v169_v8 = vrot.slane %v165_v6, 1  ;;  %v175_v9 = vrot.slane %v165_v6, 2  ;;  %v181_v14 = vrot.slane %v165_v6, 3  ;;  %p442_p0 = pneg %p441_p11  ;;  %p447_p13 = scmp.lt.s32.totalorder %s445_s13, %s439_s5 }
  0x41   : > { %v166_v10 = vsel %vm164_vm1, %v163_v7, 0.0  ;;  %v187_v18 = vrot.slane %v165_v6, 4 }
  0x42   : > { %v170_v11 = vrot.slane %v166_v10, 1  ;;  %v173_v12 = vadd.f32 %v169_v8, %v165_v6  ;;  %v176_v13 = vrot.slane %v166_v10, 2  ;;  %v182_v17 = vrot.slane %v166_v10, 3  ;;  %p448_p3 = por %p447_p13, %p446_p7 }
  0x43   : > { %v188_v21 = vrot.slane %v166_v10, 4 }
  0x44   : > { %v174_v15 = vadd.f32 %v170_v11, %v166_v10  ;;  %v179_v16 = vadd.f32 %v175_v9, %v173_v12  ;;  %p449_p6 = pnand %p448_p3, %p442_p0 }
  0x46   : > { %v180_v19 = vadd.f32 %v176_v13, %v174_v15  ;;  %v185_v20 = vadd.f32 %v181_v14, %v179_v16 }
  0x48   : > { %v186_v22 = vadd.f32 %v182_v17, %v180_v19  ;;  %v191_v23 = vadd.f32 %v187_v18, %v185_v20 }
  0x4a   : > { %v192_v24 = vadd.f32 %v188_v21, %v186_v22  ;;  %v193_v25 = vmul.f32 2e-05, %v191_v23 }
  0x4c   : > { %v194_v26 = vmul.f32 2e-05, %v192_v24  ;;  %v195_v27 = vadd.f32 2.0, %v193_v25 }
  0x4e   : > { %v196_v28 = vadd.f32 2.0, %v194_v26  ;;  %401 = vrsqrt.f32 %v195_v27 }
  0x50   : > { %403 = vrsqrt.f32 %v196_v28 }
  0x58   : > { %v402_v29 = vpop.eup %401 }
  0x59   : > { %405 = vrsqrt.f32 %v402_v29  ;;  %vm201_vm2 = vcmp.eq.f32.partialorder %v402_v29, inf  ;;  %v204_v32 = vand.u32 2147483648, %v402_v29  ;;  %vm203_vm3 = vcmp.eq.f32.partialorder %v402_v29, 0.0 }
  0x5a   : > { %v404_v30 = vpop.eup %403 }
  0x5b   : > { %407 = vrsqrt.f32 %v404_v30  ;;  %vm208_vm4 = vcmp.eq.f32.partialorder %v404_v30, inf  ;;  %v211_v35 = vand.u32 2147483648, %v404_v30  ;;  %vm210_vm5 = vcmp.eq.f32.partialorder %v404_v30, 0.0 }
  0x63   : > { %v406_v31 = vpop.eup %405 }
  0x64   : > { %v200_v33 = vmul.f32 %v406_v31, %v402_v29 }
  0x65   : > { %v408_v34 = vpop.eup %407 }
  0x66   : > { %v202_v36 = vsel %vm201_vm2, %v402_v29, %v200_v33  ;;  %v207_v37 = vmul.f32 %v408_v34, %v404_v30 }
  0x67   : > { %v205_v38 = vsel %vm203_vm3, %v204_v32, %v202_v36 }
  0x68   : > { %v209_v39 = vsel %vm208_vm4, %v404_v30, %v207_v37  ;;  %v213_v40 = vmul.f32 %v402_v29, %v205_v38 }
  0x69   : > { %v212_v41 = vsel %vm210_vm5, %v211_v35, %v209_v39 }
  0x6a   : > { %v214_v42 = vmul.f32 %v404_v30, %v212_v41 }
  0x6c   : > { %v217_v43 = vcombine.low %v213_v40, %v214_v42 }
  0x6e   : > { %v219_v44 = vmul.f32 %v217_v43, %v153_v0 }
  0x70   : > { %220 = vst [vmem:[%s150_s18] sm:$0xff] %v219_v44 }
  0x71   : > { %452 = shalt.err (!%p449_p6)
}
  0x72   : > { %s453_s15 = scalar_lea.hbm %s664_s3, 128  ;;  %s457_s22 = scalar_lea.hbm %s712_s1, 256 }
  0x73   : > { %p454_p4 = scmp.ne.s32.totalorder %s664_s3, %s453_s15  ;;  %p458_p1 = scmp.lt.u32.totalorder %s664_s3, %s712_s1 }
  0x74   : > { %p459_p2 = scmp.lt.u32.totalorder %s457_s22, %s453_s15  ;;  %p461_p8 = scmp.lt.u32.totalorder %s453_s15, %s664_s3 }
  0x75   : > { %p455_p10 = pnand %p454_p4, %p721_p9 }
  0x76   : > { %p460_p5 = por %p459_p2, %p458_p1 }
  0x77   : > { %p456_p12 = pneg %p455_p10 }
  0x78   : > { %p462_p11 = por %p461_p8, %p460_p5 }
  0x7a   : > { %p463_p0 = pnand %p462_p11, %p456_p12 }
  0x7c   : > { %466 = shalt.err (!%p463_p0)
}
  0x7d   : > { %341 = dma.vmem_to_hbm [thread:$0]  (%p721_p9), %s659_s27, 128, %s664_s3, %s222_s4  }
  0x7e PF: > { %s250_s25 = sand.u32 1, %s501_s6   ;;  %p722_p7 = scmp.ne.s32.totalorder %s717_s21, 0 }
  0x7f   : > { %p723_p13 = scmp.ge.s32.totalorder %s521_s11, 2  ;;  %s251_s26 = scalar_lea.sflag [#allocation4], %s250_s25 }
  0x81   : > { %p348_p3 = pnand %p723_p13, %p722_p7 }
  0x83   : > { %496 = dma.done.wait (!%p348_p3), %s251_s26, 128  }
  0x84   : > { %498 = vsyncadd (!%p348_p3), %s251_s26, 4294967168  ;;  %s17_s11 = sadd.s32 1, %s521_s11   ;;  %s724_s6 = smov %s505_s7 }
  0x85   : > { %p14_p6 = scmp.ge.s32.totalorder %s17_s11, 4   ;;  %s725_s7 = smov %s509_s8 }
  0x86   : > { %s726_s8 = smov %s591_s20  ;;  %s727_s9 = smov %s517_s10 }
  0x87   : > { %s728_s10 = smov %s730_s14  ;;  %16 = sbr.rel (!%p14_p6) target bundleno = 6 (0x6), region = 69 }
  0x8e   :  { %256 = vsyncpa [#allocation3], 1 }
  0x8f   :  { %258 = vsyncpa [#allocation3 + $0x1], 1 }
  0x90   :  { %259 = vsyncpa [#allocation4], 1 }
  0x91   :  { %261 = vsyncpa [#allocation4 + $0x1], 1 }

</bundles_post_ra>
